<compile_context>
chip_gen: v7x
topology: tpu7x:2x2x1
jax: 0.10.0
libtpu: 0.0.40
codegen_flags: <defaults>
</compile_context>

<pallas_src>
import functools

import jax
import jax.numpy as jnp
from jax import lax
from jax.experimental import pallas as pl
from jax.experimental.pallas import tpu as pltpu


def _round_up(x, m):
    return ((x + m - 1) // m) * m


def _cdiv(a, b):
    return -(-a // b)


def _floor_pow2(x):
    return 1 << (max(int(x), 1).bit_length() - 1)


def _mse_scatter_kernel(idx_ref, x_ref, t_ref, seg_ref, scal_ref, cnt_ref, *,
                        num_segments, tile_rows, chunk, chunks_per_tile,
                        n_rows, rows_per_group, need_mask):
    """One grid step streams `tile_rows` rows; compute is done in static `chunk`-row
    sub-chunks. Per-segment sums + counts accumulate in resident VMEM; the last grid
    step divides by the counts and also emits the scalar sum of the segment means."""
    i = pl.program_id(0)

    @pl.when(i == 0)
    def _init():
        seg_ref[...] = jnp.zeros_like(seg_ref)
        cnt_ref[...] = jnp.zeros_like(cnt_ref)
        scal_ref[...] = jnp.zeros_like(scal_ref)

    # Hoisted loop-invariant iotas (JAX does not CSE broadcast_in_dim).
    seg_iota = lax.broadcasted_iota(jnp.int32, (num_segments, chunk), 0)
    row_iota = lax.broadcasted_iota(jnp.int32, (chunk, 1), 0)

    acc = jnp.zeros(seg_ref.shape, jnp.float32)
    cnt = jnp.zeros(cnt_ref.shape, jnp.float32)
    # Static sub-chunk loop: keeps (chunk, F) temporaries / (B, chunk) one-hot small
    # while the BlockSpec tile (DMA granule) stays large.
    for c in range(chunks_per_tile):
        r0 = c * chunk
        x = x_ref[r0:r0 + chunk, :].astype(jnp.float32)
        t = t_ref[r0:r0 + chunk, :].astype(jnp.float32)
        d = x - t
        if need_mask:
            # Rows past the real end of the array read undefined data; zero them so
            # 0 * NaN/Inf cannot leak into the accumulator. (Counts are already safe
            # because the padded idx entries are -1.)
            rows = i * tile_rows + r0 + row_iota
            d = jnp.where(rows < n_rows, d, 0.0)
        sq = d * d                                               # (chunk, Fk) f32

        ids = idx_ref[:, r0:r0 + chunk]                          # (1, chunk) int32, -1 = pad
        oh = (seg_iota == ids).astype(jnp.float32)               # (B, chunk) lane-dense

        # (B, K) x (K, Fk) on the MXU with f32 accumulation.
        acc = acc + jnp.dot(oh, sq, preferred_element_type=jnp.float32)
        # Per-segment row counts folded into the kernel (no XLA scatter-add).
        cnt = cnt + jnp.sum(oh, axis=1, keepdims=True)

    seg_ref[...] += acc
    cnt_ref[...] += cnt

    @pl.when(i == pl.num_programs(0) - 1)
    def _finalize():
        # scatter-mean: empty segments stay 0 (count clamped to 1).
        denom = jnp.maximum(cnt_ref[...], 1.0) * float(rows_per_group)   # (B, 1)
        seg = seg_ref[...] / denom
        seg_ref[...] = seg
        # Scalar sum of the per-segment means (lane reduce then sublane reduce);
        # 'mean'/'sum' reductions need no follow-up pass over the (B, F) output.
        scal_ref[...] = jnp.sum(jnp.sum(seg, axis=1, keepdims=True),
                                axis=0, keepdims=True)


def mse_loss_pallas(input_, target, batch_idx, reduction="mean", *,
                    num_segments=None, contiguous_segments=False,
                    target_step_bytes=4 << 20):
    """Pallas equivalent of mse_loss(input, target, batch_idx, reduction).

    input_, target: [N, F] float arrays (f32 or bf16); batch_idx: [N] int32 ids.
    num_segments: REQUIRED static number of segments B (no host sync is performed).
    contiguous_segments: set True only if batch_idx is contiguous/sorted and every
        segment's row count is a multiple of 128//F (flattened-grid PDE batches);
        enables lane folding of small F into full 128-lane rows.
    target_step_bytes: HBM bytes of (input+target) streamed per grid step.
    """
    input_ = jnp.asarray(input_)
    target = jnp.asarray(target)
    batch_idx = jnp.asarray(batch_idx, dtype=jnp.int32)

    if input_.ndim != 2 or target.shape != input_.shape:
        raise ValueError("expected matching [N, F] input/target")
    n, f = input_.shape
    if num_segments is None:
        raise ValueError("num_segments must be provided statically "
                         "(avoids a host-side max() sync on batch_idx).")
    num_segments = int(num_segments)

    # ---- optional lane folding for F < 128 (free row-major reshape) ----
    g = 1
    if contiguous_segments and f < 128 and (128 % f == 0):
        g = 128 // f
        while g > 1 and (n % g) != 0:
            g //= 2
    nk, fk = n // g, f * g
    xk = input_.reshape(nk, fk) if g > 1 else input_
    tk = target.reshape(nk, fk) if g > 1 else target
    idxk = batch_idx.reshape(nk, g)[:, 0] if g > 1 else batch_idx

    # ---- byte-budgeted tile sizing (lane-padded VMEM footprint per row) ----
    itemsize = jnp.dtype(xk.dtype).itemsize
    row_vmem = _round_up(fk, 128) * itemsize

    chunk = max(8, min(512, _floor_pow2((256 * 1024) // row_vmem)))   # compute granule
    tile_align = max(chunk, 128)

    def _budget_rows(nbytes):
        return max(tile_align, (nbytes // (2 * row_vmem)) // tile_align * tile_align)

    # ~target_step_bytes of x+t per step, capped so double-buffered inputs stay well
    # under the smallest (v7x) VMEM.
    budget = min(_budget_rows(int(target_step_bytes)), _budget_rows(12 << 20))

    nk8 = _round_up(nk, 8)
    if nk8 <= chunk:
        tile_rows, chunk_eff, num_tiles = nk8, nk8, 1
    else:
        tile_rows = min(budget, _round_up(nk, tile_align))
        chunk_eff = chunk
        num_tiles = _cdiv(nk, tile_rows)
    chunks_per_tile = tile_rows // chunk_eff
    need_mask = (num_tiles * tile_rows != nk)

    # Pad ONLY the tiny index vector (with -1); the big [N, F] arrays are not copied.
    n_idx_pad = num_tiles * tile_rows
    idx_pad = idxk if n_idx_pad == nk else jnp.pad(
        idxk, (0, n_idx_pad - nk), constant_values=-1)
    idx2d = idx_pad.reshape(1, n_idx_pad)

    # Explicit VMEM limit: 2 inputs x 2 pipeline buffers + headroom for outputs/temps.
    vmem_limit = int(min(96 << 20, max(32 << 20, 4 * tile_rows * row_vmem + (8 << 20))))

    kernel = functools.partial(
        _mse_scatter_kernel,
        num_segments=num_segments, tile_rows=tile_rows, chunk=chunk_eff,
        chunks_per_tile=chunks_per_tile, n_rows=nk, rows_per_group=g,
        need_mask=need_mask)

    seg, scal = pl.pallas_call(
        kernel,
        out_shape=(jax.ShapeDtypeStruct((num_segments, fk), jnp.float32),
                   jax.ShapeDtypeStruct((1, 1), jnp.float32)),
        grid_spec=pltpu.PrefetchScalarGridSpec(
            num_scalar_prefetch=0,
            grid=(num_tiles,),
            in_specs=[
                pl.BlockSpec((1, tile_rows), lambda i: (0, i)),     # batch_idx (lanes)
                pl.BlockSpec((tile_rows, fk), lambda i: (i, 0)),    # input tile
                pl.BlockSpec((tile_rows, fk), lambda i: (i, 0)),    # target tile
            ],
            out_specs=(
                pl.BlockSpec((num_segments, fk), lambda i: (0, 0)),  # per-seg means
                pl.BlockSpec((1, 1), lambda i: (0, 0)),              # scalar sum
            ),
            scratch_shapes=[pltpu.VMEM((num_segments, 1), jnp.float32)],
        ),
        compiler_params=pltpu.CompilerParams(
            dimension_semantics=("arbitrary",),
            vmem_limit_bytes=vmem_limit,
        ),
    )(idx2d, xk, tk)

    if reduction == "mean":
        return scal[0, 0] / (num_segments * f)
    elif reduction == "sum":
        return scal[0, 0]
    elif reduction == "none":
        if g > 1:
            return seg.reshape(num_segments, g, f).sum(axis=1)
        return seg
    else:
        raise NotImplementedError(reduction)


def _reference(input_, target, batch_idx, num_segments, reduction="mean"):
    """Pure-JAX reference (segment mean of squared diff)."""
    sq = (input_.astype(jnp.float32) - target.astype(jnp.float32)) ** 2
    sums = jax.ops.segment_sum(sq, batch_idx, num_segments=num_segments)
    cnt = jax.ops.segment_sum(jnp.ones((input_.shape[0],), jnp.float32),
                              batch_idx, num_segments=num_segments)
    loss = sums / jnp.maximum(cnt, 1.0)[:, None]
    if reduction == "mean":
        return jnp.mean(loss)
    if reduction == "sum":
        return jnp.sum(loss)
    return loss


if __name__ == "__main__":
    key = jax.random.PRNGKey(0)
    k1, k2, k3, k4, k5, k6 = jax.random.split(key, 6)

    # Case 1: module-consistent small shapes (4 samples * 16 grid points, 32 channels),
    # contiguous segment ids -> exercises the lane-folded path (g = 128/32 = 4).
    N, F, B = 64, 32, 4
    x = jax.random.normal(k1, (N, F), dtype=jnp.float32)
    y = jax.random.normal(k2, (N, F), dtype=jnp.float32)
    bi = jnp.repeat(jnp.arange(B, dtype=jnp.int32), N // B)

    out = jax.block_until_ready(mse_loss_pallas(
        x, y, bi, reduction="mean", num_segments=B, contiguous_segments=True))
    ref = _reference(x, y, bi, B, reduction="mean")
    assert jnp.allclose(out, ref, rtol=1e-5, atol=1e-5), (out, ref)

    out_none = jax.block_until_ready(mse_loss_pallas(
        x, y, bi, reduction="none", num_segments=B, contiguous_segments=True))
    ref_none = _reference(x, y, bi, B, reduction="none")
    assert jnp.allclose(out_none, ref_none, rtol=1e-5, atol=1e-5)

    # Case 2: N not a multiple of the tile, non-contiguous (random) segment ids,
    # small target_step_bytes to force the multi-tile accumulation path.
    N2, F2, B2 = 1000, 32, 5
    x2 = jax.random.normal(k3, (N2, F2), dtype=jnp.float32)
    y2 = jax.random.normal(k4, (N2, F2), dtype=jnp.float32)
    bi2 = jax.random.randint(jax.random.PRNGKey(7), (N2,), 0, B2, dtype=jnp.int32)

    out2 = jax.block_until_ready(mse_loss_pallas(
        x2, y2, bi2, reduction="sum", num_segments=B2, target_step_bytes=1 << 18))
    ref2 = _reference(x2, y2, bi2, B2, reduction="sum")
    assert jnp.allclose(out2, ref2, rtol=1e-5, atol=1e-4), (out2, ref2)

    # Case 3: single large tile with several in-kernel sub-chunks + tail mask.
    N3, F3, B3 = 3000, 32, 6
    x3 = jax.random.normal(k5, (N3, F3), dtype=jnp.float32)
    y3 = jax.random.normal(k6, (N3, F3), dtype=jnp.float32)
    bi3 = jax.random.randint(jax.random.PRNGKey(11), (N3,), 0, B3, dtype=jnp.int32)

    out3 = jax.block_until_ready(mse_loss_pallas(
        x3, y3, bi3, reduction="none", num_segments=B3))
    ref3 = _reference(x3, y3, bi3, B3, reduction="none")
    assert jnp.allclose(out3, ref3, rtol=1e-5, atol=1e-4)

    print("KERNEL_OK")
</pallas_src>

<mosaic_0001>
module attributes {stable_mosaic.version = 11 : i64} {
  func.func @_mse_scatter_kernel(%arg0: i32, %arg1: memref<1x16xi32, #tpu.memory_space<vmem>>, %arg2: memref<16x128xf32, #tpu.memory_space<vmem>>, %arg3: memref<16x128xf32, #tpu.memory_space<vmem>>, %arg4: memref<4x128xf32, #tpu.memory_space<vmem>>, %arg5: memref<1x1xf32, #tpu.memory_space<vmem>>, %arg6: memref<4x1xf32, #tpu.memory_space<vmem>>) attributes {dimension_semantics = [#tpu.dimension_semantics<arbitrary>], iteration_bounds = array<i64: 1>, scalar_prefetch = 0 : i64, scratch_operands = 1 : i64, tpu.core_type = #tpu.core_type<tc>, window_params = [{transform_indices = @transform_0, window_bounds = array<i64: 1, 16>}, {transform_indices = @transform_1, window_bounds = array<i64: 16, 128>}, {transform_indices = @transform_2, window_bounds = array<i64: 16, 128>}, {pipeline_mode = #tpu.pipeline_mode<synchronous>, transform_indices = @transform_3, window_bounds = array<i64: 4, 128>}, {pipeline_mode = #tpu.pipeline_mode<synchronous>, transform_indices = @transform_4, window_bounds = array<i64: 1, 1>}]} {
    %c0_i32 = arith.constant 0 : i32
    %0 = arith.cmpi eq, %arg0, %c0_i32 : i32
    %1 = arith.extui %0 : i1 to i32
    %c0_i32_0 = arith.constant 0 : i32
    %2 = arith.cmpi ne, %1, %c0_i32_0 : i32
    scf.if %2 {
      %cst_19 = arith.constant 0.000000e+00 : f32
      %29 = vector.broadcast %cst_19 : f32 to vector<4x128xf32>
      %c0_20 = arith.constant 0 : index
      %c0_21 = arith.constant 0 : index
      %30 = vector.load %arg4[%c0_20, %c0_21] : memref<4x128xf32, #tpu.memory_space<vmem>>, vector<4x128xf32>
      tpu.vector_store %arg4[%c0_20, %c0_21], %29 {strides = array<i32>} : memref<4x128xf32, #tpu.memory_space<vmem>>, vector<4x128xf32>,
      %cst_22 = arith.constant 0.000000e+00 : f32
      %31 = vector.broadcast %cst_22 : f32 to vector<4x1xf32>
      %c0_23 = arith.constant 0 : index
      %c0_24 = arith.constant 0 : index
      %32 = vector.load %arg6[%c0_23, %c0_24] : memref<4x1xf32, #tpu.memory_space<vmem>>, vector<4x1xf32>
      tpu.vector_store %arg6[%c0_23, %c0_24], %31 {strides = array<i32>} : memref<4x1xf32, #tpu.memory_space<vmem>>, vector<4x1xf32>,
      %cst_25 = arith.constant 0.000000e+00 : f32
      %33 = vector.broadcast %cst_25 : f32 to vector<1x1xf32>
      %c0_26 = arith.constant 0 : index
      %c0_27 = arith.constant 0 : index
      %34 = vector.load %arg5[%c0_26, %c0_27] : memref<1x1xf32, #tpu.memory_space<vmem>>, vector<1x1xf32>
      tpu.vector_store %arg5[%c0_26, %c0_27], %33 {strides = array<i32>} : memref<1x1xf32, #tpu.memory_space<vmem>>, vector<1x1xf32>,
    } else {
    }
    %3 = tpu.iota {dimensions = array<i32: 0>} : vector<4x16xi32>
    %cst = arith.constant 0.000000e+00 : f32
    %4 = vector.broadcast %cst : f32 to vector<4x128xf32>
    %cst_1 = arith.constant 0.000000e+00 : f32
    %5 = vector.broadcast %cst_1 : f32 to vector<4x1xf32>
    %c0 = arith.constant 0 : index
    %c0_2 = arith.constant 0 : index
    %6 = vector.load %arg2[%c0, %c0_2] : memref<16x128xf32, #tpu.memory_space<vmem>>, vector<16x128xf32>
    %c0_3 = arith.constant 0 : index
    %c0_4 = arith.constant 0 : index
    %7 = vector.load %arg3[%c0_3, %c0_4] : memref<16x128xf32, #tpu.memory_space<vmem>>, vector<16x128xf32>
    %8 = arith.subf %6, %7 : vector<16x128xf32>
    %9 = arith.mulf %8, %8 : vector<16x128xf32>
    %c0_5 = arith.constant 0 : index
    %c0_6 = arith.constant 0 : index
    %10 = vector.load %arg1[%c0_5, %c0_6] : memref<1x16xi32, #tpu.memory_space<vmem>>, vector<1x16xi32>
    %11 = vector.broadcast %10 : vector<1x16xi32> to vector<4x16xi32>
    %12 = arith.cmpi eq, %3, %11 : vector<4x16xi32>
    %13 = arith.extui %12 : vector<4x16xi1> to vector<4x16xi32>
    %14 = arith.sitofp %13 : vector<4x16xi32> to vector<4x16xf32>
    %cst_7 = arith.constant dense<0.000000e+00> : vector<4x128xf32>
    %15 = tpu.matmul %14, %9, %cst_7 {dimension_numbers = #tpu.dot_dimension_numbers<[1], [0], [0], [1], [0, 0, 1, 1], [], []>} : vector<4x16xf32>, vector<16x128xf32>, vector<4x128xf32> -> vector<4x128xf32>
    %16 = arith.addf %4, %15 : vector<4x128xf32>
    %cst_8 = arith.constant dense<0.000000e+00> : vector<4xf32>
    %17 = vector.multi_reduction <add>, %14, %cst_8 [1] : vector<4x16xf32> to vector<4xf32>
    %18 = vector.shape_cast %17 : vector<4xf32> to vector<4x1xf32>
    %19 = arith.addf %5, %18 : vector<4x1xf32>
    %c0_9 = arith.constant 0 : index
    %c0_10 = arith.constant 0 : index
    %20 = vector.load %arg4[%c0_9, %c0_10] : memref<4x128xf32, #tpu.memory_space<vmem>>, vector<4x128xf32>
    %21 = arith.addf %20, %16 : vector<4x128xf32>
    %c0_11 = arith.constant 0 : index
    %c0_12 = arith.constant 0 : index
    %22 = vector.load %arg4[%c0_11, %c0_12] : memref<4x128xf32, #tpu.memory_space<vmem>>, vector<4x128xf32>
    tpu.vector_store %arg4[%c0_11, %c0_12], %21 {strides = array<i32>} : memref<4x128xf32, #tpu.memory_space<vmem>>, vector<4x128xf32>,
    %c0_13 = arith.constant 0 : index
    %c0_14 = arith.constant 0 : index
    %23 = vector.load %arg6[%c0_13, %c0_14] : memref<4x1xf32, #tpu.memory_space<vmem>>, vector<4x1xf32>
    %24 = arith.addf %23, %19 : vector<4x1xf32>
    %c0_15 = arith.constant 0 : index
    %c0_16 = arith.constant 0 : index
    %25 = vector.load %arg6[%c0_15, %c0_16] : memref<4x1xf32, #tpu.memory_space<vmem>>, vector<4x1xf32>
    tpu.vector_store %arg6[%c0_15, %c0_16], %24 {strides = array<i32>} : memref<4x1xf32, #tpu.memory_space<vmem>>, vector<4x1xf32>,
    %c0_i32_17 = arith.constant 0 : i32
    %26 = arith.cmpi eq, %arg0, %c0_i32_17 : i32
    %27 = arith.extui %26 : i1 to i32
    %c0_i32_18 = arith.constant 0 : i32
    %28 = arith.cmpi ne, %27, %c0_i32_18 : i32
    scf.if %28 {
      %c0_19 = arith.constant 0 : index
      %c0_20 = arith.constant 0 : index
      %29 = vector.load %arg6[%c0_19, %c0_20] : memref<4x1xf32, #tpu.memory_space<vmem>>, vector<4x1xf32>
      %cst_21 = arith.constant 1.000000e+00 : f32
      %30 = vector.broadcast %cst_21 : f32 to vector<4x1xf32>
      %31 = arith.maximumf %29, %30 : vector<4x1xf32>
      %cst_22 = arith.constant 4.000000e+00 : f32
      %32 = vector.broadcast %cst_22 : f32 to vector<4x1xf32>
      %33 = arith.mulf %31, %32 : vector<4x1xf32>
      %c0_23 = arith.constant 0 : index
      %c0_24 = arith.constant 0 : index
      %34 = vector.load %arg4[%c0_23, %c0_24] : memref<4x128xf32, #tpu.memory_space<vmem>>, vector<4x128xf32>
      %35 = vector.broadcast %33 : vector<4x1xf32> to vector<4x128xf32>
      %36 = arith.divf %34, %35 : vector<4x128xf32>
      %c0_25 = arith.constant 0 : index
      %c0_26 = arith.constant 0 : index
      %37 = vector.load %arg4[%c0_25, %c0_26] : memref<4x128xf32, #tpu.memory_space<vmem>>, vector<4x128xf32>
      tpu.vector_store %arg4[%c0_25, %c0_26], %36 {strides = array<i32>} : memref<4x128xf32, #tpu.memory_space<vmem>>, vector<4x128xf32>,
      %cst_27 = arith.constant dense<0.000000e+00> : vector<4xf32>
      %38 = vector.multi_reduction <add>, %36, %cst_27 [1] : vector<4x128xf32> to vector<4xf32>
      %39 = vector.shape_cast %38 : vector<4xf32> to vector<4x1xf32>
      %cst_28 = arith.constant dense<0.000000e+00> : vector<1xf32>
      %40 = vector.multi_reduction <add>, %39, %cst_28 [0] : vector<4x1xf32> to vector<1xf32>
      %41 = vector.shape_cast %40 : vector<1xf32> to vector<1x1xf32>
      %c0_29 = arith.constant 0 : index
      %c0_30 = arith.constant 0 : index
      %42 = vector.load %arg5[%c0_29, %c0_30] : memref<1x1xf32, #tpu.memory_space<vmem>>, vector<1x1xf32>
      tpu.vector_store %arg5[%c0_29, %c0_30], %41 {strides = array<i32>} : memref<1x1xf32, #tpu.memory_space<vmem>>, vector<1x1xf32>,
    } else {
    }
    return
  }
  func.func @transform_0(%arg0: i32) -> (i32, i32) {
    %c0_i32 = arith.constant 0 : i32
    %c0_i32_0 = arith.constant 0 : i32
    return %c0_i32, %arg0 : i32, i32
  }
  func.func @transform_1(%arg0: i32) -> (i32, i32) {
    %c0_i32 = arith.constant 0 : i32
    %c0_i32_0 = arith.constant 0 : i32
    return %arg0, %c0_i32 : i32, i32
  }
  func.func @transform_2(%arg0: i32) -> (i32, i32) {
    %c0_i32 = arith.constant 0 : i32
    %c0_i32_0 = arith.constant 0 : i32
    return %arg0, %c0_i32 : i32, i32
  }
  func.func @transform_3(%arg0: i32) -> (i32, i32) {
    %c0_i32 = arith.constant 0 : i32
    %c0_i32_0 = arith.constant 0 : i32
    %c0_i32_1 = arith.constant 0 : i32
    return %c0_i32, %c0_i32_0 : i32, i32
  }
  func.func @transform_4(%arg0: i32) -> (i32, i32) {
    %c0_i32 = arith.constant 0 : i32
    %c0_i32_0 = arith.constant 0 : i32
    %c0_i32_1 = arith.constant 0 : i32
    return %c0_i32, %c0_i32_0 : i32, i32
  }
}

</mosaic_0001>

<bundles_post_ra>
// kernel: tpu_custom_call.1
= control target key start
LH: loop header
LB: loop body
LE: loop exit
PB: predicated region body
PF: predicated region fallthrough
CT: control target
= control target key end

     0   :  { %10 = vsyncpa [#allocation4], 0  ;;  %s484_s0 = inlined_call_operand.hbm [shape: s32[1,16], index: 0, kind: input, shape index: {}]   ;;  %s485_s1 = inlined_call_operand.hbm [shape: f32[16,128], index: 1, kind: input, shape index: {}]   ;;  %s486_s2 = inlined_call_operand.hbm [shape: f32[16,128], index: 2, kind: input, shape index: {}]   ;;  %s487_s3 = inlined_call_operand.hbm [shape: f32[4,128], index: 3, kind: output, shape index: {0}]   ;;  %s488_s4 = inlined_call_operand.hbm [shape: f32[1,1], index: 4, kind: output, shape index: {1}]  }
   0x1   :  { %11 = vsyncpa [#allocation7], 0 }
   0x2   :  { %12 = vsyncpa [#allocation5], 0 }
   0x3   :  { %13 = vsyncpa [#allocation11], 0  ;;  %s376_s15 = smov [#allocation6]   ;;  %s258_s19 = scalar_lea.hbm %s485_s1, 256 }
   0x4   :  { %s29_s16 = sshll.u32 %s376_s15, 4  ;;  %p259_p0 = scmp.ne.s32.totalorder %s485_s1, %s258_s19  ;;  %s30_s16 = int_to_ptr.vmem [resolvable:$true] %s29_s16 }
   0x5   :  { %p262_p1 = scmp.lt.u32.totalorder %s258_s19, %s485_s1 }
   0x7   :  { %p264_p2 = pnand %p262_p1, %p259_p0 }
   0x9   :  { %267 = shalt.err (!%p264_p2)
}
   0xa   :  { %s268_s24 = scalar_lea.vmem %s30_s16, 256  ;;  %p273_p4 = scmp.lt.s32.totalorder %s30_s16, %s30_s16 }
   0xb   :  { %p269_p3 = scmp.ne.s32.totalorder %s30_s16, %s268_s24  ;;  %p274_p5 = scmp.lt.s32.totalorder %s268_s24, %s268_s24 }
   0xd   :  { %p275_p6 = por %p274_p5, %p273_p4 }
   0xf   :  { %p276_p7 = pnand %p275_p6, %p269_p3 }
  0x11   :  { %279 = shalt.err (!%p276_p7)
}
  0x12   :  { %s377_s25 = smov 128   ;;  %s378_s26 = smov 8  }
  0x13   :  { %35 = dma.hbm_to_vmem [thread:$0]  %s485_s1, 256, %s30_s16, [#allocation7], %s377_s25, %s377_s25, %s378_s26  }
  0x14   :  { %s379_s29 = smov [#allocation3]   ;;  %s380_s5 = smov [#allocation8]  }
  0x15   :  { %s20_s30 = sshll.u32 %s379_s29, 4  ;;  %s41_s6 = sshll.u32 %s380_s5, 4  ;;  %s21_s30 = int_to_ptr.vmem [resolvable:$true] %s20_s30  ;;  %s42_s6 = int_to_ptr.vmem [resolvable:$true] %s41_s6 }
  0x16   :  { %s280_s9 = scalar_lea.hbm %s484_s0, 16 }
  0x17   :  { %p281_p8 = scmp.ne.s32.totalorder %s484_s0, %s280_s9  ;;  %p284_p9 = scmp.lt.u32.totalorder %s280_s9, %s484_s0 }
  0x19   :  { %p286_p10 = pnand %p284_p9, %p281_p8 }
  0x1b   :  { %289 = shalt.err (!%p286_p10)
}
  0x1c   :  { %s290_s1 = scalar_lea.vmem %s21_s30, 16  ;;  %s294_s14 = scalar_lea.vmem %s21_s30, 32 }
  0x1d   :  { %p291_p11 = scmp.ne.s32.totalorder %s21_s30, %s290_s1  ;;  %p295_p12 = scmp.lt.s32.totalorder %s21_s30, %s21_s30 }
  0x1e   :  { %p296_p13 = scmp.lt.s32.totalorder %s294_s14, %s290_s1 }
  0x20   :  { %p297_p0 = por %p296_p13, %p295_p12 }
  0x22   :  { %p298_p1 = pnand %p297_p0, %p291_p11 }
  0x24   :  { %301 = shalt.err (!%p298_p1)
}
  0x25   :  { %23 = dma.hbm_to_vmem [thread:$0]  %s484_s0, 16, %s21_s30, [#allocation4]  }
  0x26   :  { %s302_s19 = scalar_lea.hbm %s486_s2, 256 }
  0x27   :  { %p303_p2 = scmp.ne.s32.totalorder %s486_s2, %s302_s19  ;;  %p306_p3 = scmp.lt.u32.totalorder %s302_s19, %s486_s2 }
  0x29   :  { %p308_p4 = pnand %p306_p3, %p303_p2 }
  0x2b   :  { %311 = shalt.err (!%p308_p4)
}
  0x2c   :  { %s312_s24 = scalar_lea.vmem %s42_s6, 256  ;;  %p317_p6 = scmp.lt.s32.totalorder %s42_s6, %s42_s6 }
  0x2d   :  { %p313_p5 = scmp.ne.s32.totalorder %s42_s6, %s312_s24  ;;  %p318_p7 = scmp.lt.s32.totalorder %s312_s24, %s312_s24 }
  0x2f   :  { %p319_p8 = por %p318_p7, %p317_p6 }
  0x31   :  { %p320_p9 = pnand %p319_p8, %p313_p5 }
  0x33   :  { %323 = shalt.err (!%p320_p9)
}
  0x34   :  { %47 = dma.hbm_to_vmem [thread:$0]  %s486_s2, 256, %s42_s6, [#allocation7], %s377_s25, %s377_s25, %s378_s26  }
  0x35   :  { %368 = dma.done.wait [#allocation4], 16  }
  0x36   :  { %369 = vsyncadd [#allocation4], 4294967280 }
  0x37   :  { %370 = dma.done.wait [#allocation7], 512  }
  0x38   :  { %371 = vsyncadd [#allocation7], 4294966784  ;;  %vm62_vm0 = vcmask 3072   ;;  %v66_v0 = vlaneseq  ;;  %v381_v1 = vmov 0.0   ;;  %v382_v2 = vmov 0.0|0.0   ;;  %v68_v5 = vld [vmem:[#allocation6] sm:$0xff] }
  0x39   :  { %63 = vst.msk [vmem:[#allocation2] sm:$0xf] %vm62_vm0, %v381_v1  ;;  %61 = vst [vmem:[#allocation9] sm:$0xf] %v381_v1  ;;  %241 = vmatprep.subr.bf16.mxu0 %v382_v2  ;;  %vm383_vm1 = vmmov 0   ;;  %vm158_vm2 = vcmask 125952  }
  0x3a   :  { %238 = vmatprep.mubr.msk.f32.mxu0 %vm383_vm1, %v381_v1  ;;  %v67_v3 = vshrl.u32 %v66_v0, 7  ;;  %v228_v4 = vld [vmem:[#allocation3] ss:$0 sm:$0xff]  ;;  %v69_v6 = vld [vmem:[#allocation6 + $0x8] sm:$0xff]  ;;  %v70_v7 = vld [vmem:[#allocation8] sm:$0xff]  ;;  %vm84_vm4 = vcmask 130048  }
  0x3b   :  { %v71_v8 = vld [vmem:[#allocation8 + $0x8] sm:$0xff]  ;;  %v72_v10 = vsub.f32 %v68_v5, %v70_v7  ;;  %v384_v16 = vmov 0   ;;  %vm185_vm5 = vcmask 1043456   ;;  %vm64_vm6 = vcmask 0   ;;  %s385_s2 = smov [#allocation9]  }
  0x3c   :  { %vm81_vm3 = vcmp.eq.s32.totalorder %v67_v3, %v228_v4  ;;  %v73_v11 = vsub.f32 %v69_v6, %v71_v8  ;;  %255 = vset.pattern.permute.xlu0 %v384_v16  ;;  %s204_s25 = sshll.u32 %s385_s2, 4  ;;  %65 = vst.msk [vmem:[#allocation10] sm:$0x1] %vm64_vm6, %v381_v1  ;;  %s205_s25 = int_to_ptr.vmem [resolvable:$true] %s204_s25 }
  0x3d   :  { %v229_v9 = vsel %vm81_vm3, 1.0, %v381_v1  ;;  %v74_v13 = vmul.f32 %v72_v10, %v72_v10  ;;  %s324_s26 = scalar_lea.vmem %s205_s25, 64  ;;  %p329_p11 = scmp.lt.s32.totalorder %s205_s25, %s205_s25 }
  0x3e   :  { %v159_v12 = vsel %vm158_vm2, %v229_v9, 0.0  ;;  %v75_v14 = vmul.f32 %v73_v11, %v73_v11  ;;  %p325_p10 = scmp.ne.s32.totalorder %s205_s25, %s324_s26  ;;  %p330_p12 = scmp.lt.s32.totalorder %s324_s26, %s324_s26 }
  0x3f   :  { %160 = vadd.xlane.f32.xlu0 %v159_v12 }
  0x40   :  { %v242_v15 = vpack.c.bf16 %v75_v14, %v74_v13  ;;  %v166_v17 = vld [vmem:[#allocation2] sm:$0xf]  ;;  %v163_v23 = vld [vmem:[#allocation9] sm:$0xf]  ;;  %p331_p13 = por %p330_p12, %p329_p11 }
  0x42   :  { %243 = vmatpush3.bf16.msra.mxu0 %v242_v15  ;;  %p332_p0 = pnand %p331_p13, %p325_p10 }
  0x45   :  { %239 = vmatmul.mubr.msk.f32.vlgmr.msra.gmra.mrb[0].mxu0 %vm84_vm4, %v229_v9 }
  0xcc   :  { %v161_v18 = vpop.xlane.xlu0 %160 }
  0xcd   :  { %v167_v19 = vadd.f32 %v166_v17, %v161_v18 }
  0xcf   :  { %169 = vst.msk [vmem:[#allocation2] sm:$0xf] %vm62_vm0, %v167_v19 }
  0xd6   :  { %v173_v20 = vld [vmem:[#allocation2] sm:$0xf] }
  0xd7   :  { %v174_v21 = vmax.f32 %v173_v20, 1.0 }
  0xd9   :  { %v175_v22 = vmul.f32 4.0, %v174_v21 }
  0xdb   :  { %179 = vperm.xlu0 %255, %v175_v22  }
 0x118   :  { %v154_v24 = vpop.f32.mrb[0].mxu0 }
 0x119   :  { %v164_v25 = vadd.f32 %v163_v23, %v154_v24  ;;  %v240_v26 = vpop.f32.mrb[1].mxu0 }
 0x11b   :  { %165 = vst [vmem:[#allocation9] sm:$0xf] %v164_v25 }
 0x122   :  { %v176_v28 = vld [vmem:[#allocation9] sm:$0xf] }
 0x15a   :  { %v180_v27 = vpop.permute.xlu0 %179 }
 0x15b   :  { %256 = vrcp.f32 %v180_v27 }
 0x165   :  { %v257_v29 = vpop.eup %256 }
 0x166   :  { %v183_v30 = vmul.f32 %v257_v29, %v176_v28 }
 0x168   :  { %v186_v31 = vsel %vm185_vm5, %v183_v30, 0.0  ;;  %184 = vst [vmem:[#allocation9] sm:$0xf] %v183_v30 }
 0x169   :  { %187 = vadd.xlane.f32.xlu1 %v186_v31 }
 0x16a   :  { %335 = shalt.err (!%p332_p0)
}
 0x16b   :  { %s336_s30 = scalar_lea.hbm %s487_s3, 64 }
 0x16c   :  { %p337_p1 = scmp.ne.s32.totalorder %s487_s3, %s336_s30  ;;  %p340_p2 = scmp.lt.u32.totalorder %s336_s30, %s487_s3 }
 0x16e   :  { %p342_p3 = pnand %p340_p2, %p337_p1 }
 0x170   :  { %345 = shalt.err (!%p342_p3)
}
 0x171   :  { %207 = dma.vmem_to_hbm [thread:$0]  %s205_s25, 64, %s487_s3, [#allocation5]  }
 0x172   :  { %s386_s11 = smov [#allocation10]  }
 0x173   :  { %s214_s12 = sshll.u32 %s386_s11, 4  ;;  %s215_s12 = int_to_ptr.vmem [resolvable:$true] %s214_s12 }
 0x174   :  { %s346_s13 = scalar_lea.vmem %s215_s12, 16  ;;  %s350_s1 = scalar_lea.vmem %s215_s12, 32 }
 0x175   :  { %p347_p4 = scmp.ne.s32.totalorder %s215_s12, %s346_s13  ;;  %p351_p5 = scmp.lt.s32.totalorder %s215_s12, %s215_s12 }
 0x176   :  { %p352_p6 = scmp.lt.s32.totalorder %s350_s1, %s346_s13 }
 0x178   :  { %p353_p7 = por %p352_p6, %p351_p5 }
 0x17a   :  { %p354_p8 = pnand %p353_p7, %p347_p4 }
 0x1f6   :  { %v188_v32 = vpop.xlane.xlu1 %187 }
 0x1f7   :  { %v189_v33 = vsel %vm185_vm5, %v188_v32, 0.0 }
 0x1f8   :  { %v190_v34 = vrot.slane %v189_v33, 4 }
 0x1fa   :  { %v191_v35 = vadd.f32 %v190_v34, %v189_v33 }
 0x1fc   :  { %v192_v36 = vrot.slane %v191_v35, 2 }
 0x1fe   :  { %v193_v37 = vadd.f32 %v192_v36, %v191_v35 }
 0x200   :  { %v194_v38 = vrot.slane %v193_v37, 1 }
 0x202   :  { %v195_v39 = vadd.f32 %v194_v38, %v193_v37 }
 0x204   :  { %197 = vst.msk [vmem:[#allocation10] sm:$0x1] %vm64_vm6, %v195_v39 }
 0x205   :  { %357 = shalt.err (!%p354_p8)
}
 0x206   :  { %s358_s15 = scalar_lea.hbm %s488_s4, 16 }
 0x207   :  { %p359_p9 = scmp.ne.s32.totalorder %s488_s4, %s358_s15  ;;  %p362_p10 = scmp.lt.u32.totalorder %s358_s15, %s488_s4 }
 0x209   :  { %p364_p11 = pnand %p362_p10, %p359_p9 }
 0x20b   :  { %367 = shalt.err (!%p364_p11)
}
 0x20c   :  { %217 = dma.vmem_to_hbm [thread:$0]  %s215_s12, 16, %s488_s4, [#allocation11]  }
 0x20d   :  { %372 = dma.done.wait [#allocation5], 64  }
 0x20e   :  { %373 = vsyncadd [#allocation5], 4294967232 }
 0x20f   :  { %374 = dma.done.wait [#allocation11], 16  }
 0x210   :  { %375 = vsyncadd [#allocation11], 4294967280 }
 0x211   :  { %224 = vsyncpa [#allocation4], 1 }
 0x212   :  { %225 = vsyncpa [#allocation7], 1 }
 0x213   :  { %226 = vsyncpa [#allocation5], 1 }
 0x214   :  { %227 = vsyncpa [#allocation11], 1 }

</bundles_post_ra>
